<compile_context>
chip_gen: v6e
topology: v6e:2x2x1
jax: 0.10.0
libtpu: 0.0.40
codegen_flags: <defaults>
</compile_context>

<pallas_src>
import math
from functools import partial

import jax
import jax.numpy as jnp
import numpy as np
from jax.experimental import pallas as pl
from jax.experimental.pallas import tpu as pltpu


def _layernorm(x, gamma, beta, eps=1e-5):
    # PyTorch nn.LayerNorm: biased variance (divide by N), eps inside sqrt.
    mu = jnp.mean(x, axis=-1, keepdims=True)
    var = jnp.mean((x - mu) ** 2, axis=-1, keepdims=True)
    return (x - mu) * jax.lax.rsqrt(var + eps) * gamma + beta


def encoder_block_kernel(num_heads,
                         x_ref,
                         wqkv_ref, bqkv_ref,
                         wo_ref, bo_ref,
                         g1_ref, be1_ref,
                         w1_ref, b1_ref, w2_ref, b2_ref,
                         g2_ref, be2_ref,
                         out_ref):
    # One grid step == one chunk of Bt batch elements; full sequence in VMEM.
    Bt, S, D = x_ref.shape
    dk = D // num_heads
    inv_scale = 1.0 / math.sqrt(dk)

    x3 = x_ref[...].astype(jnp.float32)            # (Bt, S, D)
    xf = x3.reshape(Bt * S, D)                     # fold B*S into MXU M dim

    # ---- fused Q|K|V projection: one (M, D) x (D, 3D) MXU pass ----------
    qkv = jnp.dot(xf, wqkv_ref[...],
                  preferred_element_type=jnp.float32) + bqkv_ref[...]

    # ---- multi-head self-attention, batched over the Bt chunk -----------
    head_ctx = []
    for h in range(num_heads):                     # static unroll over heads
        lo = h * dk
        qh = qkv[:, lo:lo + dk].reshape(Bt, S, dk)
        kh = qkv[:, D + lo:D + lo + dk].reshape(Bt, S, dk)
        vh = qkv[:, 2 * D + lo:2 * D + lo + dk].reshape(Bt, S, dk)

        s = jnp.einsum('bqd,bkd->bqk', qh, kh,
                       preferred_element_type=jnp.float32) * inv_scale
        s = s - jnp.max(s, axis=-1, keepdims=True)
        p = jnp.exp(s)
        denom = jnp.sum(p, axis=-1, keepdims=True)
        # EUP approximate reciprocal + one Newton step: keeps the divide off
        # the VPU critical path while retaining full f32 accuracy.
        inv = pl.reciprocal(denom, approx=True)
        inv = inv * (2.0 - denom * inv)
        p = p * inv                                # softmax over keys
        ctx = jnp.einsum('bqk,bkd->bqd', p, vh,
                         preferred_element_type=jnp.float32)
        head_ctx.append(ctx.reshape(Bt * S, dk))
    attn = jnp.concatenate(head_ctx, axis=-1)      # (Bt*S, D), head-major cols

    attn_out = jnp.dot(attn, wo_ref[...],
                       preferred_element_type=jnp.float32) + bo_ref[...]

    # residual:  x = x + norm1(attn_output)   (dropout is identity)
    x1 = xf + _layernorm(attn_out, g1_ref[...], be1_ref[...])

    # ---- Feed-forward ----------------------------------------------------
    h1 = jnp.dot(x1, w1_ref[...], preferred_element_type=jnp.float32) + b1_ref[...]
    h1 = jnp.maximum(h1, 0.0)                      # ReLU
    ff = jnp.dot(h1, w2_ref[...], preferred_element_type=jnp.float32) + b2_ref[...]

    # residual:  x = x + norm2(linear_output)
    y = x1 + _layernorm(ff, g2_ref[...], be2_ref[...])

    out_ref[...] = y.reshape(Bt, S, D).astype(out_ref.dtype)


def _pick_block_b(B, max_bt=8):
    """Largest divisor of B that is <= max_bt (batch elements per grid step)."""
    for bt in range(min(B, max_bt), 0, -1):
        if B % bt == 0:
            return bt
    return 1


def encoder_block_pallas(x, params, num_heads, block_b=None):
    B, S, D = x.shape
    F = params["w1"].shape[1]
    Bt = _pick_block_b(B) if block_b is None else block_b
    assert B % Bt == 0

    # Fuse Q|K|V weights/biases in the wrapper (free in XLA).
    wqkv = jnp.concatenate([params["wq"], params["wk"], params["wv"]], axis=1)  # (D, 3D)
    bqkv = jnp.concatenate([params["bq"], params["bk"], params["bv"]], axis=1)  # (1, 3D)

    def fullspec(shape):
        return pl.BlockSpec(shape, lambda b: (0, 0))

    # TODO(synk): at production sizes (D~1k, F~4k) tile the FFN/attention
    # matmuls over a reduction grid axis with a VMEM accumulator, set
    # vmem_limit_bytes explicitly, and pad D to a multiple of 128 so the
    # output stores are lane-dense; at these toy sizes weights are tiny and
    # kept fully resident.
    in_specs = [
        pl.BlockSpec((Bt, S, D), lambda b: (b, 0, 0)),    # x (batch chunk)
        fullspec((D, 3 * D)), fullspec((1, 3 * D)),       # fused Wqkv, bqkv
        fullspec((D, D)), fullspec((1, D)),               # Wo, bo
        fullspec((1, D)), fullspec((1, D)),               # gamma1, beta1
        fullspec((D, F)), fullspec((1, F)),               # W1, b1
        fullspec((F, D)), fullspec((1, D)),               # W2, b2
        fullspec((1, D)), fullspec((1, D)),               # gamma2, beta2
    ]

    return pl.pallas_call(
        partial(encoder_block_kernel, num_heads),
        out_shape=jax.ShapeDtypeStruct((B, S, D), x.dtype),
        grid=(B // Bt,),
        in_specs=in_specs,
        out_specs=pl.BlockSpec((Bt, S, D), lambda b: (b, 0, 0)),
        compiler_params=pltpu.CompilerParams(
            dimension_semantics=("parallel",)),           # megacore on v7x
    )(x, wqkv, bqkv,
      params["wo"], params["bo"],
      params["g1"], params["be1"],
      params["w1"], params["b1"], params["w2"], params["b2"],
      params["g2"], params["be2"])


def encoder_block_ref(x, p, num_heads):
    """Pure-JAX reference mirroring the PyTorch forward (eval mode)."""
    B, S, D = x.shape
    dk = D // num_heads
    q = x @ p["wq"] + p["bq"][0]
    k = x @ p["wk"] + p["bk"][0]
    v = x @ p["wv"] + p["bv"][0]
    q = q.reshape(B, S, num_heads, dk).transpose(0, 2, 1, 3)
    k = k.reshape(B, S, num_heads, dk).transpose(0, 2, 1, 3)
    v = v.reshape(B, S, num_heads, dk).transpose(0, 2, 1, 3)
    scores = jnp.einsum("bhqd,bhkd->bhqk", q, k) / jnp.sqrt(jnp.float32(dk))
    a = jax.nn.softmax(scores, axis=-1)
    o = jnp.einsum("bhqk,bhkd->bhqd", a, v).transpose(0, 2, 1, 3).reshape(B, S, D)
    attn_out = o @ p["wo"] + p["bo"][0]

    def ln(t, g, b, eps=1e-5):
        mu = jnp.mean(t, -1, keepdims=True)
        var = jnp.mean((t - mu) ** 2, -1, keepdims=True)
        return (t - mu) / jnp.sqrt(var + eps) * g[0] + b[0]

    x = x + ln(attn_out, p["g1"], p["be1"])
    h = jnp.maximum(x @ p["w1"] + p["b1"][0], 0.0)
    ff = h @ p["w2"] + p["b2"][0]
    x = x + ln(ff, p["g2"], p["be2"])
    return x


if __name__ == "__main__":
    # Small shapes consistent with the module: batch=2, seq=8, d_model=32,
    # num_heads=4, dim_feedforward=64.
    B, S, D, H, F = 2, 8, 32, 4, 64

    key = jax.random.PRNGKey(0)
    keys = jax.random.split(key, 16)

    def w(k, shape, scale=0.05):
        return (scale * jax.random.normal(k, shape)).astype(jnp.float32)

    params = {
        "wq": w(keys[0], (D, D)), "bq": w(keys[1], (1, D)),
        "wk": w(keys[2], (D, D)), "bk": w(keys[3], (1, D)),
        "wv": w(keys[4], (D, D)), "bv": w(keys[5], (1, D)),
        "wo": w(keys[6], (D, D)), "bo": w(keys[7], (1, D)),
        "g1": jnp.ones((1, D), jnp.float32), "be1": jnp.zeros((1, D), jnp.float32),
        "w1": w(keys[8], (D, F)), "b1": w(keys[9], (1, F)),
        "w2": w(keys[10], (F, D)), "b2": w(keys[11], (1, D)),
        "g2": jnp.ones((1, D), jnp.float32), "be2": jnp.zeros((1, D), jnp.float32),
    }

    x = jax.random.normal(keys[12], (B, S, D)).astype(jnp.float32)

    out = encoder_block_pallas(x, params, H)
    out = jax.block_until_ready(out)

    ref = encoder_block_ref(x, params, H)
    # Tolerance slightly relaxed vs 1e-4: softmax normalisation now uses the
    # EUP reciprocal (Newton-refined) and matmuls are batched/fused, which
    # changes accumulation order marginally.
    np.testing.assert_allclose(np.asarray(out), np.asarray(ref),
                               rtol=2e-4, atol=2e-4)
    print("KERNEL_OK")
</pallas_src>

<mosaic_0001>
module attributes {stable_mosaic.version = 11 : i64} {
  func.func @encoder_block_kernel(%arg0: i32, %arg1: memref<2x8x32xf32, #tpu.memory_space<vmem>>, %arg2: memref<32x96xf32, #tpu.memory_space<vmem>>, %arg3: memref<1x96xf32, #tpu.memory_space<vmem>>, %arg4: memref<32x32xf32, #tpu.memory_space<vmem>>, %arg5: memref<1x32xf32, #tpu.memory_space<vmem>>, %arg6: memref<1x32xf32, #tpu.memory_space<vmem>>, %arg7: memref<1x32xf32, #tpu.memory_space<vmem>>, %arg8: memref<32x64xf32, #tpu.memory_space<vmem>>, %arg9: memref<1x64xf32, #tpu.memory_space<vmem>>, %arg10: memref<64x32xf32, #tpu.memory_space<vmem>>, %arg11: memref<1x32xf32, #tpu.memory_space<vmem>>, %arg12: memref<1x32xf32, #tpu.memory_space<vmem>>, %arg13: memref<1x32xf32, #tpu.memory_space<vmem>>, %arg14: memref<2x8x32xf32, #tpu.memory_space<vmem>>) attributes {dimension_semantics = [#tpu.dimension_semantics<parallel>], iteration_bounds = array<i64: 1>, scalar_prefetch = 0 : i64, scratch_operands = 0 : i64, tpu.core_type = #tpu.core_type<tc>, window_params = [{transform_indices = @transform_0, window_bounds = array<i64: 2, 8, 32>}, {pipeline_mode = #tpu.pipeline_mode<synchronous>, transform_indices = @transform_1, window_bounds = array<i64: 32, 96>}, {pipeline_mode = #tpu.pipeline_mode<synchronous>, transform_indices = @transform_2, window_bounds = array<i64: 1, 96>}, {pipeline_mode = #tpu.pipeline_mode<synchronous>, transform_indices = @transform_3, window_bounds = array<i64: 32, 32>}, {pipeline_mode = #tpu.pipeline_mode<synchronous>, transform_indices = @transform_4, window_bounds = array<i64: 1, 32>}, {pipeline_mode = #tpu.pipeline_mode<synchronous>, transform_indices = @transform_5, window_bounds = array<i64: 1, 32>}, {pipeline_mode = #tpu.pipeline_mode<synchronous>, transform_indices = @transform_6, window_bounds = array<i64: 1, 32>}, {pipeline_mode = #tpu.pipeline_mode<synchronous>, transform_indices = @transform_7, window_bounds = array<i64: 32, 64>}, {pipeline_mode = #tpu.pipeline_mode<synchronous>, transform_indices = @transform_8, window_bounds = array<i64: 1, 64>}, {pipeline_mode = #tpu.pipeline_mode<synchronous>, transform_indices = @transform_9, window_bounds = array<i64: 64, 32>}, {pipeline_mode = #tpu.pipeline_mode<synchronous>, transform_indices = @transform_10, window_bounds = array<i64: 1, 32>}, {pipeline_mode = #tpu.pipeline_mode<synchronous>, transform_indices = @transform_11, window_bounds = array<i64: 1, 32>}, {pipeline_mode = #tpu.pipeline_mode<synchronous>, transform_indices = @transform_12, window_bounds = array<i64: 1, 32>}, {transform_indices = @transform_13, window_bounds = array<i64: 2, 8, 32>}]} {
    %c0 = arith.constant 0 : index
    %c0_0 = arith.constant 0 : index
    %c0_1 = arith.constant 0 : index
    %0 = vector.load %arg1[%c0, %c0_0, %c0_1] : memref<2x8x32xf32, #tpu.memory_space<vmem>>, vector<2x8x32xf32>
    %1 = vector.shape_cast %0 : vector<2x8x32xf32> to vector<16x32xf32>
    %c0_2 = arith.constant 0 : index
    %c0_3 = arith.constant 0 : index
    %2 = vector.load %arg2[%c0_2, %c0_3] : memref<32x96xf32, #tpu.memory_space<vmem>>, vector<32x96xf32>
    %cst = arith.constant dense<0.000000e+00> : vector<16x96xf32>
    %3 = tpu.matmul %1, %2, %cst {dimension_numbers = #tpu.dot_dimension_numbers<[1], [0], [0], [1], [0, 0, 1, 1], [], []>} : vector<16x32xf32>, vector<32x96xf32>, vector<16x96xf32> -> vector<16x96xf32>
    %c0_4 = arith.constant 0 : index
    %c0_5 = arith.constant 0 : index
    %4 = vector.load %arg3[%c0_4, %c0_5] : memref<1x96xf32, #tpu.memory_space<vmem>>, vector<1x96xf32>
    %5 = vector.broadcast %4 : vector<1x96xf32> to vector<16x96xf32>
    %6 = arith.addf %3, %5 : vector<16x96xf32>
    %7 = vector.extract_strided_slice %6 {offsets = [0, 0], sizes = [16, 8], strides = [1, 1]} : vector<16x96xf32> to vector<16x8xf32>
    %8 = vector.shape_cast %7 : vector<16x8xf32> to vector<2x8x8xf32>
    %9 = vector.extract_strided_slice %6 {offsets = [0, 32], sizes = [16, 8], strides = [1, 1]} : vector<16x96xf32> to vector<16x8xf32>
    %10 = vector.shape_cast %9 : vector<16x8xf32> to vector<2x8x8xf32>
    %11 = vector.extract_strided_slice %6 {offsets = [0, 64], sizes = [16, 8], strides = [1, 1]} : vector<16x96xf32> to vector<16x8xf32>
    %12 = vector.shape_cast %11 : vector<16x8xf32> to vector<2x8x8xf32>
    "tpu.trace_start"() <{level = 10 : i32, message = "bqd,bkd->bqk"}> : () -> ()
    %cst_6 = arith.constant dense<0.000000e+00> : vector<2x8x8xf32>
    %13 = tpu.matmul %8, %10, %cst_6 {dimension_numbers = #tpu.dot_dimension_numbers<[2], [2], [1], [1], [0, 0, 0, 1, 1, 1], [0], [0]>} : vector<2x8x8xf32>, vector<2x8x8xf32>, vector<2x8x8xf32> -> vector<2x8x8xf32>
    "tpu.trace_stop"() : () -> ()
    %cst_7 = arith.constant 0.353553385 : f32
    %14 = vector.broadcast %cst_7 : f32 to vector<2x8x8xf32>
    %15 = arith.mulf %13, %14 : vector<2x8x8xf32>
    %cst_8 = arith.constant dense<0xFF800000> : vector<2x8xf32>
    %16 = vector.multi_reduction <maximumf>, %15, %cst_8 [2] : vector<2x8x8xf32> to vector<2x8xf32>
    %17 = vector.shape_cast %16 : vector<2x8xf32> to vector<2x8x1xf32>
    %18 = vector.broadcast %17 : vector<2x8x1xf32> to vector<2x8x8xf32>
    %19 = arith.subf %15, %18 : vector<2x8x8xf32>
    %20 = math.exp %19 : vector<2x8x8xf32>
    %cst_9 = arith.constant dense<0.000000e+00> : vector<2x8xf32>
    %21 = vector.multi_reduction <add>, %20, %cst_9 [2] : vector<2x8x8xf32> to vector<2x8xf32>
    %22 = vector.shape_cast %21 : vector<2x8xf32> to vector<2x8x1xf32>
    %23 = tpu.reciprocal %22 {approx = true} : vector<2x8x1xf32> -> vector<2x8x1xf32>
    %24 = arith.mulf %22, %23 : vector<2x8x1xf32>
    %cst_10 = arith.constant 2.000000e+00 : f32
    %25 = vector.broadcast %cst_10 : f32 to vector<2x8x1xf32>
    %26 = arith.subf %25, %24 : vector<2x8x1xf32>
    %27 = arith.mulf %23, %26 : vector<2x8x1xf32>
    %28 = vector.broadcast %27 : vector<2x8x1xf32> to vector<2x8x8xf32>
    %29 = arith.mulf %20, %28 : vector<2x8x8xf32>
    "tpu.trace_start"() <{level = 10 : i32, message = "bqk,bkd->bqd"}> : () -> ()
    %cst_11 = arith.constant dense<0.000000e+00> : vector<2x8x8xf32>
    %30 = tpu.matmul %29, %12, %cst_11 {dimension_numbers = #tpu.dot_dimension_numbers<[2], [1], [1], [2], [0, 0, 0, 1, 1, 2], [0], [0]>} : vector<2x8x8xf32>, vector<2x8x8xf32>, vector<2x8x8xf32> -> vector<2x8x8xf32>
    "tpu.trace_stop"() : () -> ()
    %31 = vector.shape_cast %30 : vector<2x8x8xf32> to vector<16x8xf32>
    %32 = vector.extract_strided_slice %6 {offsets = [0, 8], sizes = [16, 8], strides = [1, 1]} : vector<16x96xf32> to vector<16x8xf32>
    %33 = vector.shape_cast %32 : vector<16x8xf32> to vector<2x8x8xf32>
    %34 = vector.extract_strided_slice %6 {offsets = [0, 40], sizes = [16, 8], strides = [1, 1]} : vector<16x96xf32> to vector<16x8xf32>
    %35 = vector.shape_cast %34 : vector<16x8xf32> to vector<2x8x8xf32>
    %36 = vector.extract_strided_slice %6 {offsets = [0, 72], sizes = [16, 8], strides = [1, 1]} : vector<16x96xf32> to vector<16x8xf32>
    %37 = vector.shape_cast %36 : vector<16x8xf32> to vector<2x8x8xf32>
    "tpu.trace_start"() <{level = 10 : i32, message = "bqd,bkd->bqk"}> : () -> ()
    %cst_12 = arith.constant dense<0.000000e+00> : vector<2x8x8xf32>
    %38 = tpu.matmul %33, %35, %cst_12 {dimension_numbers = #tpu.dot_dimension_numbers<[2], [2], [1], [1], [0, 0, 0, 1, 1, 1], [0], [0]>} : vector<2x8x8xf32>, vector<2x8x8xf32>, vector<2x8x8xf32> -> vector<2x8x8xf32>
    "tpu.trace_stop"() : () -> ()
    %cst_13 = arith.constant 0.353553385 : f32
    %39 = vector.broadcast %cst_13 : f32 to vector<2x8x8xf32>
    %40 = arith.mulf %38, %39 : vector<2x8x8xf32>
    %cst_14 = arith.constant dense<0xFF800000> : vector<2x8xf32>
    %41 = vector.multi_reduction <maximumf>, %40, %cst_14 [2] : vector<2x8x8xf32> to vector<2x8xf32>
    %42 = vector.shape_cast %41 : vector<2x8xf32> to vector<2x8x1xf32>
    %43 = vector.broadcast %42 : vector<2x8x1xf32> to vector<2x8x8xf32>
    %44 = arith.subf %40, %43 : vector<2x8x8xf32>
    %45 = math.exp %44 : vector<2x8x8xf32>
    %cst_15 = arith.constant dense<0.000000e+00> : vector<2x8xf32>
    %46 = vector.multi_reduction <add>, %45, %cst_15 [2] : vector<2x8x8xf32> to vector<2x8xf32>
    %47 = vector.shape_cast %46 : vector<2x8xf32> to vector<2x8x1xf32>
    %48 = tpu.reciprocal %47 {approx = true} : vector<2x8x1xf32> -> vector<2x8x1xf32>
    %49 = arith.mulf %47, %48 : vector<2x8x1xf32>
    %cst_16 = arith.constant 2.000000e+00 : f32
    %50 = vector.broadcast %cst_16 : f32 to vector<2x8x1xf32>
    %51 = arith.subf %50, %49 : vector<2x8x1xf32>
    %52 = arith.mulf %48, %51 : vector<2x8x1xf32>
    %53 = vector.broadcast %52 : vector<2x8x1xf32> to vector<2x8x8xf32>
    %54 = arith.mulf %45, %53 : vector<2x8x8xf32>
    "tpu.trace_start"() <{level = 10 : i32, message = "bqk,bkd->bqd"}> : () -> ()
    %cst_17 = arith.constant dense<0.000000e+00> : vector<2x8x8xf32>
    %55 = tpu.matmul %54, %37, %cst_17 {dimension_numbers = #tpu.dot_dimension_numbers<[2], [1], [1], [2], [0, 0, 0, 1, 1, 2], [0], [0]>} : vector<2x8x8xf32>, vector<2x8x8xf32>, vector<2x8x8xf32> -> vector<2x8x8xf32>
    "tpu.trace_stop"() : () -> ()
    %56 = vector.shape_cast %55 : vector<2x8x8xf32> to vector<16x8xf32>
    %57 = vector.extract_strided_slice %6 {offsets = [0, 16], sizes = [16, 8], strides = [1, 1]} : vector<16x96xf32> to vector<16x8xf32>
    %58 = vector.shape_cast %57 : vector<16x8xf32> to vector<2x8x8xf32>
    %59 = vector.extract_strided_slice %6 {offsets = [0, 48], sizes = [16, 8], strides = [1, 1]} : vector<16x96xf32> to vector<16x8xf32>
    %60 = vector.shape_cast %59 : vector<16x8xf32> to vector<2x8x8xf32>
    %61 = vector.extract_strided_slice %6 {offsets = [0, 80], sizes = [16, 8], strides = [1, 1]} : vector<16x96xf32> to vector<16x8xf32>
    %62 = vector.shape_cast %61 : vector<16x8xf32> to vector<2x8x8xf32>
    "tpu.trace_start"() <{level = 10 : i32, message = "bqd,bkd->bqk"}> : () -> ()
    %cst_18 = arith.constant dense<0.000000e+00> : vector<2x8x8xf32>
    %63 = tpu.matmul %58, %60, %cst_18 {dimension_numbers = #tpu.dot_dimension_numbers<[2], [2], [1], [1], [0, 0, 0, 1, 1, 1], [0], [0]>} : vector<2x8x8xf32>, vector<2x8x8xf32>, vector<2x8x8xf32> -> vector<2x8x8xf32>
    "tpu.trace_stop"() : () -> ()
    %cst_19 = arith.constant 0.353553385 : f32
    %64 = vector.broadcast %cst_19 : f32 to vector<2x8x8xf32>
    %65 = arith.mulf %63, %64 : vector<2x8x8xf32>
    %cst_20 = arith.constant dense<0xFF800000> : vector<2x8xf32>
    %66 = vector.multi_reduction <maximumf>, %65, %cst_20 [2] : vector<2x8x8xf32> to vector<2x8xf32>
    %67 = vector.shape_cast %66 : vector<2x8xf32> to vector<2x8x1xf32>
    %68 = vector.broadcast %67 : vector<2x8x1xf32> to vector<2x8x8xf32>
    %69 = arith.subf %65, %68 : vector<2x8x8xf32>
    %70 = math.exp %69 : vector<2x8x8xf32>
    %cst_21 = arith.constant dense<0.000000e+00> : vector<2x8xf32>
    %71 = vector.multi_reduction <add>, %70, %cst_21 [2] : vector<2x8x8xf32> to vector<2x8xf32>
    %72 = vector.shape_cast %71 : vector<2x8xf32> to vector<2x8x1xf32>
    %73 = tpu.reciprocal %72 {approx = true} : vector<2x8x1xf32> -> vector<2x8x1xf32>
    %74 = arith.mulf %72, %73 : vector<2x8x1xf32>
    %cst_22 = arith.constant 2.000000e+00 : f32
    %75 = vector.broadcast %cst_22 : f32 to vector<2x8x1xf32>
    %76 = arith.subf %75, %74 : vector<2x8x1xf32>
    %77 = arith.mulf %73, %76 : vector<2x8x1xf32>
    %78 = vector.broadcast %77 : vector<2x8x1xf32> to vector<2x8x8xf32>
    %79 = arith.mulf %70, %78 : vector<2x8x8xf32>
    "tpu.trace_start"() <{level = 10 : i32, message = "bqk,bkd->bqd"}> : () -> ()
    %cst_23 = arith.constant dense<0.000000e+00> : vector<2x8x8xf32>
    %80 = tpu.matmul %79, %62, %cst_23 {dimension_numbers = #tpu.dot_dimension_numbers<[2], [1], [1], [2], [0, 0, 0, 1, 1, 2], [0], [0]>} : vector<2x8x8xf32>, vector<2x8x8xf32>, vector<2x8x8xf32> -> vector<2x8x8xf32>
    "tpu.trace_stop"() : () -> ()
    %81 = vector.shape_cast %80 : vector<2x8x8xf32> to vector<16x8xf32>
    %82 = vector.extract_strided_slice %6 {offsets = [0, 24], sizes = [16, 8], strides = [1, 1]} : vector<16x96xf32> to vector<16x8xf32>
    %83 = vector.shape_cast %82 : vector<16x8xf32> to vector<2x8x8xf32>
    %84 = vector.extract_strided_slice %6 {offsets = [0, 56], sizes = [16, 8], strides = [1, 1]} : vector<16x96xf32> to vector<16x8xf32>
    %85 = vector.shape_cast %84 : vector<16x8xf32> to vector<2x8x8xf32>
    %86 = vector.extract_strided_slice %6 {offsets = [0, 88], sizes = [16, 8], strides = [1, 1]} : vector<16x96xf32> to vector<16x8xf32>
    %87 = vector.shape_cast %86 : vector<16x8xf32> to vector<2x8x8xf32>
    "tpu.trace_start"() <{level = 10 : i32, message = "bqd,bkd->bqk"}> : () -> ()
    %cst_24 = arith.constant dense<0.000000e+00> : vector<2x8x8xf32>
    %88 = tpu.matmul %83, %85, %cst_24 {dimension_numbers = #tpu.dot_dimension_numbers<[2], [2], [1], [1], [0, 0, 0, 1, 1, 1], [0], [0]>} : vector<2x8x8xf32>, vector<2x8x8xf32>, vector<2x8x8xf32> -> vector<2x8x8xf32>
    "tpu.trace_stop"() : () -> ()
    %cst_25 = arith.constant 0.353553385 : f32
    %89 = vector.broadcast %cst_25 : f32 to vector<2x8x8xf32>
    %90 = arith.mulf %88, %89 : vector<2x8x8xf32>
    %cst_26 = arith.constant dense<0xFF800000> : vector<2x8xf32>
    %91 = vector.multi_reduction <maximumf>, %90, %cst_26 [2] : vector<2x8x8xf32> to vector<2x8xf32>
    %92 = vector.shape_cast %91 : vector<2x8xf32> to vector<2x8x1xf32>
    %93 = vector.broadcast %92 : vector<2x8x1xf32> to vector<2x8x8xf32>
    %94 = arith.subf %90, %93 : vector<2x8x8xf32>
    %95 = math.exp %94 : vector<2x8x8xf32>
    %cst_27 = arith.constant dense<0.000000e+00> : vector<2x8xf32>
    %96 = vector.multi_reduction <add>, %95, %cst_27 [2] : vector<2x8x8xf32> to vector<2x8xf32>
    %97 = vector.shape_cast %96 : vector<2x8xf32> to vector<2x8x1xf32>
    %98 = tpu.reciprocal %97 {approx = true} : vector<2x8x1xf32> -> vector<2x8x1xf32>
    %99 = arith.mulf %97, %98 : vector<2x8x1xf32>
    %cst_28 = arith.constant 2.000000e+00 : f32
    %100 = vector.broadcast %cst_28 : f32 to vector<2x8x1xf32>
    %101 = arith.subf %100, %99 : vector<2x8x1xf32>
    %102 = arith.mulf %98, %101 : vector<2x8x1xf32>
    %103 = vector.broadcast %102 : vector<2x8x1xf32> to vector<2x8x8xf32>
    %104 = arith.mulf %95, %103 : vector<2x8x8xf32>
    "tpu.trace_start"() <{level = 10 : i32, message = "bqk,bkd->bqd"}> : () -> ()
    %cst_29 = arith.constant dense<0.000000e+00> : vector<2x8x8xf32>
    %105 = tpu.matmul %104, %87, %cst_29 {dimension_numbers = #tpu.dot_dimension_numbers<[2], [1], [1], [2], [0, 0, 0, 1, 1, 2], [0], [0]>} : vector<2x8x8xf32>, vector<2x8x8xf32>, vector<2x8x8xf32> -> vector<2x8x8xf32>
    "tpu.trace_stop"() : () -> ()
    %106 = vector.shape_cast %105 : vector<2x8x8xf32> to vector<16x8xf32>
    %107 = tpu.concatenate %31, %56, %81, %106 in 1 : vector<16x8xf32>, vector<16x8xf32>, vector<16x8xf32>, vector<16x8xf32> -> vector<16x32xf32>
    %c0_30 = arith.constant 0 : index
    %c0_31 = arith.constant 0 : index
    %108 = vector.load %arg4[%c0_30, %c0_31] : memref<32x32xf32, #tpu.memory_space<vmem>>, vector<32x32xf32>
    %cst_32 = arith.constant dense<0.000000e+00> : vector<16x32xf32>
    %109 = tpu.matmul %107, %108, %cst_32 {dimension_numbers = #tpu.dot_dimension_numbers<[1], [0], [0], [1], [0, 0, 1, 1], [], []>} : vector<16x32xf32>, vector<32x32xf32>, vector<16x32xf32> -> vector<16x32xf32>
    %c0_33 = arith.constant 0 : index
    %c0_34 = arith.constant 0 : index
    %110 = vector.load %arg5[%c0_33, %c0_34] : memref<1x32xf32, #tpu.memory_space<vmem>>, vector<1x32xf32>
    %111 = vector.broadcast %110 : vector<1x32xf32> to vector<16x32xf32>
    %112 = arith.addf %109, %111 : vector<16x32xf32>
    %c0_35 = arith.constant 0 : index
    %c0_36 = arith.constant 0 : index
    %113 = vector.load %arg6[%c0_35, %c0_36] : memref<1x32xf32, #tpu.memory_space<vmem>>, vector<1x32xf32>
    %c0_37 = arith.constant 0 : index
    %c0_38 = arith.constant 0 : index
    %114 = vector.load %arg7[%c0_37, %c0_38] : memref<1x32xf32, #tpu.memory_space<vmem>>, vector<1x32xf32>
    %cst_39 = arith.constant dense<0.000000e+00> : vector<16xf32>
    %115 = vector.multi_reduction <add>, %112, %cst_39 [1] : vector<16x32xf32> to vector<16xf32>
    %116 = vector.shape_cast %115 : vector<16xf32> to vector<16x1xf32>
    %cst_40 = arith.constant 3.200000e+01 : f32
    %117 = vector.broadcast %cst_40 : f32 to vector<16x1xf32>
    %118 = arith.divf %116, %117 : vector<16x1xf32>
    %119 = vector.broadcast %118 : vector<16x1xf32> to vector<16x32xf32>
    %120 = arith.subf %112, %119 : vector<16x32xf32>
    %121 = arith.mulf %120, %120 : vector<16x32xf32>
    %cst_41 = arith.constant dense<0.000000e+00> : vector<16xf32>
    %122 = vector.multi_reduction <add>, %121, %cst_41 [1] : vector<16x32xf32> to vector<16xf32>
    %123 = vector.shape_cast %122 : vector<16xf32> to vector<16x1xf32>
    %cst_42 = arith.constant 3.200000e+01 : f32
    %124 = vector.broadcast %cst_42 : f32 to vector<16x1xf32>
    %125 = arith.divf %123, %124 : vector<16x1xf32>
    %126 = vector.broadcast %118 : vector<16x1xf32> to vector<16x32xf32>
    %127 = arith.subf %112, %126 : vector<16x32xf32>
    %cst_43 = arith.constant 9.99999974E-6 : f32
    %128 = vector.broadcast %cst_43 : f32 to vector<16x1xf32>
    %129 = arith.addf %125, %128 : vector<16x1xf32>
    %130 = math.rsqrt %129 : vector<16x1xf32>
    %131 = vector.broadcast %130 : vector<16x1xf32> to vector<16x32xf32>
    %132 = arith.mulf %127, %131 : vector<16x32xf32>
    %133 = vector.broadcast %113 : vector<1x32xf32> to vector<16x32xf32>
    %134 = arith.mulf %132, %133 : vector<16x32xf32>
    %135 = vector.broadcast %114 : vector<1x32xf32> to vector<16x32xf32>
    %136 = arith.addf %134, %135 : vector<16x32xf32>
    %137 = arith.addf %1, %136 : vector<16x32xf32>
    %c0_44 = arith.constant 0 : index
    %c0_45 = arith.constant 0 : index
    %138 = vector.load %arg8[%c0_44, %c0_45] : memref<32x64xf32, #tpu.memory_space<vmem>>, vector<32x64xf32>
    %cst_46 = arith.constant dense<0.000000e+00> : vector<16x64xf32>
    %139 = tpu.matmul %137, %138, %cst_46 {dimension_numbers = #tpu.dot_dimension_numbers<[1], [0], [0], [1], [0, 0, 1, 1], [], []>} : vector<16x32xf32>, vector<32x64xf32>, vector<16x64xf32> -> vector<16x64xf32>
    %c0_47 = arith.constant 0 : index
    %c0_48 = arith.constant 0 : index
    %140 = vector.load %arg9[%c0_47, %c0_48] : memref<1x64xf32, #tpu.memory_space<vmem>>, vector<1x64xf32>
    %141 = vector.broadcast %140 : vector<1x64xf32> to vector<16x64xf32>
    %142 = arith.addf %139, %141 : vector<16x64xf32>
    %cst_49 = arith.constant 0.000000e+00 : f32
    %143 = vector.broadcast %cst_49 : f32 to vector<16x64xf32>
    %144 = arith.maximumf %142, %143 : vector<16x64xf32>
    %c0_50 = arith.constant 0 : index
    %c0_51 = arith.constant 0 : index
    %145 = vector.load %arg10[%c0_50, %c0_51] : memref<64x32xf32, #tpu.memory_space<vmem>>, vector<64x32xf32>
    %cst_52 = arith.constant dense<0.000000e+00> : vector<16x32xf32>
    %146 = tpu.matmul %144, %145, %cst_52 {dimension_numbers = #tpu.dot_dimension_numbers<[1], [0], [0], [1], [0, 0, 1, 1], [], []>} : vector<16x64xf32>, vector<64x32xf32>, vector<16x32xf32> -> vector<16x32xf32>
    %c0_53 = arith.constant 0 : index
    %c0_54 = arith.constant 0 : index
    %147 = vector.load %arg11[%c0_53, %c0_54] : memref<1x32xf32, #tpu.memory_space<vmem>>, vector<1x32xf32>
    %148 = vector.broadcast %147 : vector<1x32xf32> to vector<16x32xf32>
    %149 = arith.addf %146, %148 : vector<16x32xf32>
    %c0_55 = arith.constant 0 : index
    %c0_56 = arith.constant 0 : index
    %150 = vector.load %arg12[%c0_55, %c0_56] : memref<1x32xf32, #tpu.memory_space<vmem>>, vector<1x32xf32>
    %c0_57 = arith.constant 0 : index
    %c0_58 = arith.constant 0 : index
    %151 = vector.load %arg13[%c0_57, %c0_58] : memref<1x32xf32, #tpu.memory_space<vmem>>, vector<1x32xf32>
    %cst_59 = arith.constant dense<0.000000e+00> : vector<16xf32>
    %152 = vector.multi_reduction <add>, %149, %cst_59 [1] : vector<16x32xf32> to vector<16xf32>
    %153 = vector.shape_cast %152 : vector<16xf32> to vector<16x1xf32>
    %cst_60 = arith.constant 3.200000e+01 : f32
    %154 = vector.broadcast %cst_60 : f32 to vector<16x1xf32>
    %155 = arith.divf %153, %154 : vector<16x1xf32>
    %156 = vector.broadcast %155 : vector<16x1xf32> to vector<16x32xf32>
    %157 = arith.subf %149, %156 : vector<16x32xf32>
    %158 = arith.mulf %157, %157 : vector<16x32xf32>
    %cst_61 = arith.constant dense<0.000000e+00> : vector<16xf32>
    %159 = vector.multi_reduction <add>, %158, %cst_61 [1] : vector<16x32xf32> to vector<16xf32>
    %160 = vector.shape_cast %159 : vector<16xf32> to vector<16x1xf32>
    %cst_62 = arith.constant 3.200000e+01 : f32
    %161 = vector.broadcast %cst_62 : f32 to vector<16x1xf32>
    %162 = arith.divf %160, %161 : vector<16x1xf32>
    %163 = vector.broadcast %155 : vector<16x1xf32> to vector<16x32xf32>
    %164 = arith.subf %149, %163 : vector<16x32xf32>
    %cst_63 = arith.constant 9.99999974E-6 : f32
    %165 = vector.broadcast %cst_63 : f32 to vector<16x1xf32>
    %166 = arith.addf %162, %165 : vector<16x1xf32>
    %167 = math.rsqrt %166 : vector<16x1xf32>
    %168 = vector.broadcast %167 : vector<16x1xf32> to vector<16x32xf32>
    %169 = arith.mulf %164, %168 : vector<16x32xf32>
    %170 = vector.broadcast %150 : vector<1x32xf32> to vector<16x32xf32>
    %171 = arith.mulf %169, %170 : vector<16x32xf32>
    %172 = vector.broadcast %151 : vector<1x32xf32> to vector<16x32xf32>
    %173 = arith.addf %171, %172 : vector<16x32xf32>
    %174 = arith.addf %137, %173 : vector<16x32xf32>
    %175 = vector.shape_cast %174 : vector<16x32xf32> to vector<2x8x32xf32>
    %c0_64 = arith.constant 0 : index
    %c0_65 = arith.constant 0 : index
    %c0_66 = arith.constant 0 : index
    %176 = vector.load %arg14[%c0_64, %c0_65, %c0_66] : memref<2x8x32xf32, #tpu.memory_space<vmem>>, vector<2x8x32xf32>
    tpu.vector_store %arg14[%c0_64, %c0_65, %c0_66], %175 {strides = array<i32>} : memref<2x8x32xf32, #tpu.memory_space<vmem>>, vector<2x8x32xf32>,
    return
  }
  func.func @transform_0(%arg0: i32) -> (i32, i32, i32) {
    %c0_i32 = arith.constant 0 : i32
    %c0_i32_0 = arith.constant 0 : i32
    %c0_i32_1 = arith.constant 0 : i32
    return %arg0, %c0_i32, %c0_i32_0 : i32, i32, i32
  }
  func.func @transform_1(%arg0: i32) -> (i32, i32) {
    %c0_i32 = arith.constant 0 : i32
    %c0_i32_0 = arith.constant 0 : i32
    %c0_i32_1 = arith.constant 0 : i32
    return %c0_i32, %c0_i32_0 : i32, i32
  }
  func.func @transform_2(%arg0: i32) -> (i32, i32) {
    %c0_i32 = arith.constant 0 : i32
    %c0_i32_0 = arith.constant 0 : i32
    %c0_i32_1 = arith.constant 0 : i32
    return %c0_i32, %c0_i32_0 : i32, i32
  }
  func.func @transform_3(%arg0: i32) -> (i32, i32) {
    %c0_i32 = arith.constant 0 : i32
    %c0_i32_0 = arith.constant 0 : i32
    %c0_i32_1 = arith.constant 0 : i32
    return %c0_i32, %c0_i32_0 : i32, i32
  }
  func.func @transform_4(%arg0: i32) -> (i32, i32) {
    %c0_i32 = arith.constant 0 : i32
    %c0_i32_0 = arith.constant 0 : i32
    %c0_i32_1 = arith.constant 0 : i32
    return %c0_i32, %c0_i32_0 : i32, i32
  }
  func.func @transform_5(%arg0: i32) -> (i32, i32) {
    %c0_i32 = arith.constant 0 : i32
    %c0_i32_0 = arith.constant 0 : i32
    %c0_i32_1 = arith.constant 0 : i32
    return %c0_i32, %c0_i32_0 : i32, i32
  }
  func.func @transform_6(%arg0: i32) -> (i32, i32) {
    %c0_i32 = arith.constant 0 : i32
    %c0_i32_0 = arith.constant 0 : i32
    %c0_i32_1 = arith.constant 0 : i32
    return %c0_i32, %c0_i32_0 : i32, i32
  }
  func.func @transform_7(%arg0: i32) -> (i32, i32) {
    %c0_i32 = arith.constant 0 : i32
    %c0_i32_0 = arith.constant 0 : i32
    %c0_i32_1 = arith.constant 0 : i32
    return %c0_i32, %c0_i32_0 : i32, i32
  }
  func.func @transform_8(%arg0: i32) -> (i32, i32) {
    %c0_i32 = arith.constant 0 : i32
    %c0_i32_0 = arith.constant 0 : i32
    %c0_i32_1 = arith.constant 0 : i32
    return %c0_i32, %c0_i32_0 : i32, i32
  }
  func.func @transform_9(%arg0: i32) -> (i32, i32) {
    %c0_i32 = arith.constant 0 : i32
    %c0_i32_0 = arith.constant 0 : i32
    %c0_i32_1 = arith.constant 0 : i32
    return %c0_i32, %c0_i32_0 : i32, i32
  }
  func.func @transform_10(%arg0: i32) -> (i32, i32) {
    %c0_i32 = arith.constant 0 : i32
    %c0_i32_0 = arith.constant 0 : i32
    %c0_i32_1 = arith.constant 0 : i32
    return %c0_i32, %c0_i32_0 : i32, i32
  }
  func.func @transform_11(%arg0: i32) -> (i32, i32) {
    %c0_i32 = arith.constant 0 : i32
    %c0_i32_0 = arith.constant 0 : i32
    %c0_i32_1 = arith.constant 0 : i32
    return %c0_i32, %c0_i32_0 : i32, i32
  }
  func.func @transform_12(%arg0: i32) -> (i32, i32) {
    %c0_i32 = arith.constant 0 : i32
    %c0_i32_0 = arith.constant 0 : i32
    %c0_i32_1 = arith.constant 0 : i32
    return %c0_i32, %c0_i32_0 : i32, i32
  }
  func.func @transform_13(%arg0: i32) -> (i32, i32, i32) {
    %c0_i32 = arith.constant 0 : i32
    %c0_i32_0 = arith.constant 0 : i32
    %c0_i32_1 = arith.constant 0 : i32
    return %arg0, %c0_i32, %c0_i32_0 : i32, i32, i32
  }
}

</mosaic_0001>

<bundles_post_ra>
// kernel: tpu_custom_call.1
= control target key start
LH: loop header
LB: loop body
LE: loop exit
PB: predicated region body
PF: predicated region fallthrough
CT: control target
= control target key end

     0   :  { %18 = vsyncpa [#allocation3], 0  ;;  %s2616_s0 = inlined_call_operand.hbm [shape: f32[2,8,32], index: 0, kind: input, shape index: {}]   ;;  %s2617_s1 = inlined_call_operand.vmem [shape: f32[32,96], index: 1, kind: input, shape index: {}]   ;;  %s2618_s2 = inlined_call_operand.vmem [shape: f32[1,96], index: 2, kind: input, shape index: {}]   ;;  %s2619_s3 = inlined_call_operand.vmem [shape: f32[32,32], index: 3, kind: input, shape index: {}]   ;;  %s2620_s4 = inlined_call_operand.vmem [shape: f32[1,32], index: 4, kind: input, shape index: {}]   ;;  %s2621_s5 = inlined_call_operand.vmem [shape: f32[1,32], index: 5, kind: input, shape index: {}]   ;;  %s2622_s6 = inlined_call_operand.vmem [shape: f32[1,32], index: 6, kind: input, shape index: {}]   ;;  %s2623_s7 = inlined_call_operand.vmem [shape: f32[32,64], index: 7, kind: input, shape index: {}]   ;;  %s2624_s8 = inlined_call_operand.vmem [shape: f32[1,64], index: 8, kind: input, shape index: {}]   ;;  %s2625_s9 = inlined_call_operand.vmem [shape: f32[64,32], index: 9, kind: input, shape index: {}]   ;;  %s2626_s10 = inlined_call_operand.vmem [shape: f32[1,32], index: 10, kind: input, shape index: {}]   ;;  %s2627_s11 = inlined_call_operand.vmem [shape: f32[1,32], index: 11, kind: input, shape index: {}]   ;;  %s2628_s12 = inlined_call_operand.vmem [shape: f32[1,32], index: 12, kind: input, shape index: {}]   ;;  %s2629_s13 = inlined_call_operand.hbm [shape: f32[2,8,32], index: 13, kind: output, shape index: {}]  }
   0x1   :  { %19 = vsyncpa [#allocation4], 0  ;;  %s2267_s25 = smov [#allocation2]  }
   0x2   :  { %s25_s26 = sshll.u32 %s2267_s25, 4  ;;  %s26_s26 = int_to_ptr.vmem [resolvable:$true] %s25_s26 }
   0x3   :  { %s2231_s27 = scalar_lea.vmem %s26_s26, 256  ;;  %p2236_p1 = scmp.lt.s32.totalorder %s26_s26, %s26_s26 }
   0x4   :  { %p2232_p0 = scmp.ne.s32.totalorder %s26_s26, %s2231_s27  ;;  %p2237_p2 = scmp.lt.s32.totalorder %s2231_s27, %s2231_s27 }
   0x6   :  { %p2238_p3 = por %p2237_p2, %p2236_p1 }
   0x8   :  { %p2239_p4 = pnand %p2238_p3, %p2232_p0 }
   0xa   :  { %2242 = shalt.err (!%p2239_p4)
}
   0xb   :  { %s2268_s28 = smov 128   ;;  %s2269_s29 = smov 8  }
   0xc   :  { %31 = dma.hbm_to_vmem [thread:$0]  %s2616_s0, 256, %s26_s26, [#allocation3], %s2268_s28, %s2268_s28, %s2269_s29  }
   0xd   :  { %2263 = dma.done.wait [#allocation3], 256  }
   0xe   :  { %2264 = vsyncadd [#allocation3], 4294967040  ;;  %vm72_vm0 = vcmask 261120   ;;  %v64_v0 = vld [vmem:[%s2617_s1 + $0x18] sm:$0xff]  ;;  %v63_v1 = vld [vmem:[%s2617_s1 + $0x10] sm:$0xff]  ;;  %v2270_v6 = vmov 0.0  }
   0xf   :  { %2032 = vmatprep.subr.mxu1 %v64_v0  ;;  %v2368_v2 = vld [vmem:[#allocation2] sm:$0xff]  ;;  %v62_v3 = vld [vmem:[%s2617_s1 + $0x8] sm:$0xff]  ;;  %2053 = vmatprep.subr.mxu0 %v2270_v6  ;;  %vm2271_vm1 = vmmov 0   ;;  %s2272_s23 = smov 96   ;;  %vm157_vm2 = vcmask 64512   ;;  %s2274_s24 = smov 88  }
  0x10   :  { %2033 = vmatpush3.msra.mxu1 %v64_v0  ;;  %2040 = vmatprep.mubr.msk.f32.mxu1 %vm72_vm0, %v2368_v2  ;;  %v61_v4 = vld [vmem:[%s2617_s1] sm:$0xff]  ;;  %v2378_v5 = vld [vmem:[#allocation2 + $0x8] sm:$0xff]  ;;  %s2275_s25 = smov 120   ;;  %s2276_s26 = smov 56   ;;  %vm1534_vm3 = vcmask 195584   ;;  %vm1531_vm4 = vcmask 130048  }
  0x11   :  { %2034 = vmatprep.subr.mxu1 %v63_v1  ;;  %2055 = vmatprep.mubr.msk.f32.mxu0 %vm2271_vm1, %v2270_v6  ;;  %v1932_v8 = vld [vmem:[%s2618_s2] ss:$0 sm:$0xff]  ;;  %s2273_s2 = smov 64   ;;  %s2277_s27 = smov 80   ;;  %vm1785_vm5 = vcmask 523264  }
  0x12   :  { %2035 = vmatpush3.msra.mxu1 %v63_v1  ;;  %s2278_s30 = smov 112   ;;  %s2279_s14 = smov 48  }
  0x13   :  { %2036 = vmatprep.subr.mxu1 %v62_v3  ;;  %s2280_s15 = smov 72   ;;  %s2281_s16 = smov 104  }
  0x14   :  { %2037 = vmatpush3.msra.mxu1 %v62_v3  ;;  %s2282_s17 = smov 40   ;;  %s2283_s18 = smov 16  }
  0x15   :  { %2038 = vmatprep.subr.mxu1 %v61_v4  ;;  %s2285_s20 = smov [#allocation5]  }
  0x16   :  { %2039 = vmatpush3.msra.mxu1 %v61_v4  ;;  %s1920_s0 = sshll.u32 %s2285_s20, 4  ;;  %s1921_s0 = int_to_ptr.vmem [resolvable:$true] %s1920_s0 }
  0x17   :  { %2041 = vmatmul.mubr.msk.f32.vlgmr.msra.gmra.mxu1 %vm72_vm0, %v2378_v5  ;;  %2043 = vmatprep.subr.mxu1 %v2270_v6  ;;  %p2248_p6 = scmp.lt.s32.totalorder %s1921_s0, %s1921_s0 }
  0x18   :  { %2045 = vmatprep.mubr.msk.f32.mxu1 %vm2271_vm1, %v2270_v6 }
  0xd7   :  { %v2042_v7 = vpop.f32.mrf.mxu1 }
  0xd8   :  { %v2394_v11 = vadd.f32 %v2042_v7, %v1932_v8 }
  0xd9   :  { %v145_v9 = vpop.f32.mrf.mxu1 }
  0xda   :  { %v2391_v10 = vadd.f32 %v1932_v8, %v145_v9 }
  0xdc   :  { %155 = vrot.lane.b32.xlu0 %v2391_v10, %s2272_s23 }
  0xe0   :  { %233 = vrot.lane.b32.xlu0 %v2394_v11, %s2272_s23 }
 0x14e   :  { %v156_v12 = vpop.permute.xlu0 %155 }
 0x14f   :  { %2044 = vmatpush3.xpose.msk.msra.mxu1 %vm157_vm2, %v156_v12 }
 0x150   :  { %2048 = vmatprep.subr.mxu1 %v2270_v6 }
 0x152   :  { %2046 = vmatmul.mubr.msk.f32.vlgmr.msra.gmra.mxu1 %vm157_vm2, %v2391_v10  ;;  %v234_v13 = vpop.permute.xlu0 %233 }
 0x153   :  { %2049 = vmatpush3.xpose.msk.msra.mxu1 %vm157_vm2, %v234_v13  ;;  %2050 = vmatprep.mubr.msk.f32.mxu1 %vm2271_vm1, %v2270_v6 }
 0x154   :  { %2058 = vmatprep.subr.mxu1 %v2270_v6 }
 0x156   :  { %2051 = vmatmul.mubr.msk.f32.vlgmr.msra.gmra.mxu1 %vm157_vm2, %v2394_v11 }
 0x157   :  { %2060 = vmatprep.mubr.msk.f32.mxu1 %vm2271_vm1, %v2270_v6 }
 0x212   :  { %v228_v14 = vpop.f32.mrf.mxu1 }
 0x213   :  { %v309_v15 = vmul.f32 0.35355338, %v228_v14 }
 0x214   :  { %v2047_v16 = vpop.f32.mrf.mxu1 }
 0x215   :  { %v311_v17 = vsel %vm157_vm2, %v309_v15, -inf }
 0x216   :  { %312 = vmax.xlane.f32.xlu1 %v311_v17  ;;  %v305_v18 = vpop.f32.mrf.mxu1 }
 0x217   :  { %v310_v19 = vmul.f32 0.35355338, %v305_v18 }
 0x218   :  { %v2052_v20 = vpop.f32.mrf.mxu1 }
 0x219   :  { %v314_v21 = vsel %vm157_vm2, %v310_v19, -inf }
 0x21a   :  { %315 = vmax.xlane.f32.xlu1 %v314_v21 }
 0x22b   :  { %339 = vrot.lane.b32.xlu1 %v2391_v10, %s2273_s2 }
 0x22f   :  { %415 = vrot.lane.b32.xlu1 %v2394_v11, %s2273_s2 }
 0x233   :  { %493 = vrot.lane.b32.xlu1 %v2391_v10, %s2274_s24 }
 0x29f   :  { %v313_v22 = vpop.xlane.xlu1 %312 }
 0x2a0   :  { %v317_v23 = vsub.f32 %v309_v15, %v313_v22 }
 0x2a2   :  { %v319_v24 = vmul.f32 1.442695, %v317_v23 }
 0x2a3   :  { %v316_v25 = vpop.xlane.xlu1 %315 }
 0x2a4   :  { %2183 = vpow2.f32 %v319_v24  ;;  %v318_v26 = vsub.f32 %v310_v19, %v316_v25 }
 0x2a6   :  { %v321_v27 = vmul.f32 1.442695, %v318_v26 }
 0x2a7   :  { %v340_v28 = vpop.permute.xlu1 %339 }
 0x2a8   :  { %2185 = vpow2.f32 %v321_v27  ;;  %2054 = vmatpush3.msra.mxu0 %v340_v28 }
 0x2a9   :  { %2063 = vmatprep.subr.mxu0 %v2270_v6 }
 0x2ab   :  { %v416_v29 = vpop.permute.xlu1 %415 }
 0x2ac   :  { %2059 = vmatpush3.msra.mxu1 %v416_v29 }
 0x2ad   :  { %2068 = vmatprep.subr.mxu1 %v2270_v6 }
 0x2af   :  { %v494_v34 = vpop.permute.xlu1 %493 }
 0x2b1   :  { %v2184_v30 = vpop.eup %2183 }
 0x2b2   :  { %v323_v31 = vsel %vm157_vm2, %v2184_v30, 0.0 }
 0x2b3   :  { %324 = vadd.xlane.f32.xlu0 %v323_v31 }
 0x2b5   :  { %v2186_v32 = vpop.eup %2185 }
 0x2b6   :  { %v326_v33 = vsel %vm157_vm2, %v2186_v32, 0.0 }
 0x2b7   :  { %327 = vadd.xlane.f32.xlu1 %v326_v33 }
 0x2c8   :  { %571 = vrot.lane.b32.xlu1 %v2394_v11, %s2274_s24  ;;  %s2284_s24 = smov 24  }
 0x2c9   :  { %491 = vrot.lane.b32.xlu0 %v2391_v10, %s2275_s25 }
 0x2cc   :  { %569 = vrot.lane.b32.xlu1 %v2394_v11, %s2275_s25 }
 0x33c   :  { %v325_v35 = vpop.xlane.xlu0 %324 }
 0x33d   :  { %2187 = vrcp.f32 %v325_v35 }
 0x340   :  { %v328_v36 = vpop.xlane.xlu1 %327  ;;  %v492_v48 = vpop.permute.xlu0 %491 }
 0x341   :  { %2189 = vrcp.f32 %v328_v36 }
 0x344   :  { %v572_v46 = vpop.permute.xlu1 %571 }
 0x348   :  { %v570_v49 = vpop.permute.xlu1 %569 }
 0x34a   :  { %v2188_v37 = vpop.eup %2187 }
 0x34b   :  { %v331_v38 = vmul.f32 %v2188_v37, %v325_v35 }
 0x34d   :  { %v333_v39 = vsub.f32 2.0, %v331_v38 }
 0x34e   :  { %v2190_v40 = vpop.eup %2189 }
 0x34f   :  { %v335_v41 = vmul.f32 %v2188_v37, %v333_v39  ;;  %v332_v42 = vmul.f32 %v2190_v40, %v328_v36 }
 0x351   :  { %v337_v43 = vmul.f32 %v2184_v30, %v335_v41  ;;  %v334_v44 = vsub.f32 2.0, %v332_v42 }
 0x353   :  { %v336_v45 = vmul.f32 %v2190_v40, %v334_v44  ;;  %2056 = vmatmul.mubr.msk.f32.vlgmr.msra.gmra.mxu0 %vm157_vm2, %v337_v43 }
 0x354   :  { %2064 = vmatpush3.xpose.msk.msra.mxu0 %vm157_vm2, %v494_v34  ;;  %2065 = vmatprep.mubr.msk.f32.mxu0 %vm2271_vm1, %v2270_v6 }
 0x355   :  { %v338_v47 = vmul.f32 %v2186_v32, %v336_v45  ;;  %2073 = vmatprep.subr.mxu0 %v2270_v6 }
 0x357   :  { %2061 = vmatmul.mubr.msk.f32.vlgmr.msra.gmra.mxu1 %vm157_vm2, %v338_v47  ;;  %2066 = vmatmul.mubr.msk.f32.vlgmr.msra.gmra.mxu0 %vm157_vm2, %v492_v48 }
 0x358   :  { %2069 = vmatpush3.xpose.msk.msra.mxu1 %vm157_vm2, %v572_v46  ;;  %2070 = vmatprep.mubr.msk.f32.mxu1 %vm2271_vm1, %v2270_v6 }
 0x359   :  { %2078 = vmatprep.subr.mxu1 %v2270_v6  ;;  %2075 = vmatprep.mubr.msk.f32.mxu0 %vm2271_vm1, %v2270_v6 }
 0x35b   :  { %2071 = vmatmul.mubr.msk.f32.vlgmr.msra.gmra.mxu1 %vm157_vm2, %v570_v49 }
 0x35c   :  { %2080 = vmatprep.mubr.msk.f32.mxu1 %vm2271_vm1, %v2270_v6 }
 0x413   :  { %v2437_v50 = vpop.f32.mrf.mxu0 }
 0x415   :  { %v2057_v51 = vpop.f32.mrf.mxu0 }
 0x417   :  { %v2439_v52 = vpop.f32.mrf.mxu1  ;;  %v565_v53 = vpop.f32.mrf.mxu0 }
 0x418   :  { %v647_v54 = vmul.f32 0.35355338, %v565_v53 }
 0x419   :  { %v2062_v55 = vpop.f32.mrf.mxu1  ;;  %v2067_v56 = vpop.f32.mrf.mxu0 }
 0x41a   :  { %v649_v57 = vsel %vm157_vm2, %v647_v54, -inf }
 0x41b   :  { %v643_v58 = vpop.f32.mrf.mxu1  ;;  %650 = vmax.xlane.f32.xlu1 %v649_v57 }
 0x41c   :  { %v648_v59 = vmul.f32 0.35355338, %v643_v58 }
 0x41d   :  { %v2072_v60 = vpop.f32.mrf.mxu1 }
 0x41e   :  { %v652_v61 = vsel %vm157_vm2, %v648_v59, -inf }
 0x41f   :  { %653 = vmax.xlane.f32.xlu0 %v652_v61 }
 0x42c   :  { %677 = vrot.lane.b32.xlu1 %v2391_v10, %s2276_s26 }
 0x430   :  { %831 = vrot.lane.b32.xlu1 %v2391_v10, %s2277_s27 }
 0x435   :  { %753 = vrot.lane.b32.xlu0 %v2394_v11, %s2276_s26 }
 0x439   :  { %829 = vrot.lane.b32.xlu0 %v2391_v10, %s2278_s30 }
 0x4a4   :  { %v651_v62 = vpop.xlane.xlu1 %650 }
 0x4a5   :  { %v655_v63 = vsub.f32 %v647_v54, %v651_v62 }
 0x4a7   :  { %v657_v0 = vmul.f32 1.442695, %v655_v63 }
 0x4a8   :  { %v678_v1 = vpop.permute.xlu1 %677  ;;  %v654_v3 = vpop.xlane.xlu0 %653 }
 0x4a9   :  { %2191 = vpow2.f32 %v657_v0  ;;  %v656_v4 = vsub.f32 %v648_v59, %v654_v3  ;;  %2074 = vmatpush3.msra.mxu0 %v678_v1 }
 0x4aa   :  { %2083 = vmatprep.subr.mxu0 %v2270_v6 }
 0x4ab   :  { %v659_v7 = vmul.f32 1.442695, %v656_v4 }
 0x4ac   :  { %v754_v8 = vpop.permute.xlu0 %753  ;;  %v832_v15 = vpop.permute.xlu1 %831 }
 0x4ad   :  { %2193 = vpow2.f32 %v659_v7  ;;  %2079 = vmatpush3.msra.mxu1 %v754_v8 }
 0x4ae   :  { %2088 = vmatprep.subr.mxu1 %v2270_v6 }
 0x4b0   :  { %v830_v29 = vpop.permute.xlu0 %829 }
 0x4b6   :  { %v2192_v9 = vpop.eup %2191 }
 0x4b7   :  { %v661_v12 = vsel %vm157_vm2, %v2192_v9, 0.0 }
 0x4b8   :  { %662 = vadd.xlane.f32.xlu1 %v661_v12 }
 0x4ba   :  { %v2194_v13 = vpop.eup %2193 }
 0x4bb   :  { %v664_v14 = vsel %vm157_vm2, %v2194_v13, 0.0 }
 0x4bc   :  { %665 = vadd.xlane.f32.xlu1 %v664_v14 }
 0x4cd   :  { %909 = vrot.lane.b32.xlu1 %v2394_v11, %s2277_s27 }
 0x4d1   :  { %907 = vrot.lane.b32.xlu1 %v2394_v11, %s2278_s30 }
 0x541   :  { %v663_v16 = vpop.xlane.xlu1 %662 }
 0x542   :  { %2195 = vrcp.f32 %v663_v16 }
 0x545   :  { %v666_v17 = vpop.xlane.xlu1 %665 }
 0x546   :  { %2197 = vrcp.f32 %v666_v17 }
 0x549   :  { %v910_v27 = vpop.permute.xlu1 %909 }
 0x54d   :  { %v908_v30 = vpop.permute.xlu1 %907 }
 0x54f   :  { %v2196_v18 = vpop.eup %2195 }
 0x550   :  { %v669_v19 = vmul.f32 %v2196_v18, %v663_v16 }
 0x552   :  { %v671_v20 = vsub.f32 2.0, %v669_v19 }
 0x553   :  { %v2198_v21 = vpop.eup %2197 }
 0x554   :  { %v673_v22 = vmul.f32 %v2196_v18, %v671_v20  ;;  %v670_v23 = vmul.f32 %v2198_v21, %v666_v17 }
 0x556   :  { %v675_v24 = vmul.f32 %v2192_v9, %v673_v22  ;;  %v672_v25 = vsub.f32 2.0, %v670_v23 }
 0x558   :  { %v674_v26 = vmul.f32 %v2198_v21, %v672_v25  ;;  %2076 = vmatmul.mubr.msk.f32.vlgmr.msra.gmra.mxu0 %vm157_vm2, %v675_v24 }
 0x559   :  { %2084 = vmatpush3.xpose.msk.msra.mxu0 %vm157_vm2, %v832_v15  ;;  %2085 = vmatprep.mubr.msk.f32.mxu0 %vm2271_vm1, %v2270_v6 }
 0x55a   :  { %v676_v28 = vmul.f32 %v2194_v13, %v674_v26  ;;  %2093 = vmatprep.subr.mxu0 %v2270_v6 }
 0x55c   :  { %2081 = vmatmul.mubr.msk.f32.vlgmr.msra.gmra.mxu1 %vm157_vm2, %v676_v28  ;;  %2086 = vmatmul.mubr.msk.f32.vlgmr.msra.gmra.mxu0 %vm157_vm2, %v830_v29 }
 0x55d   :  { %2089 = vmatpush3.xpose.msk.msra.mxu1 %vm157_vm2, %v910_v27  ;;  %2090 = vmatprep.mubr.msk.f32.mxu1 %vm2271_vm1, %v2270_v6 }
 0x55e   :  { %2098 = vmatprep.subr.mxu1 %v2270_v6  ;;  %2095 = vmatprep.mubr.msk.f32.mxu0 %vm2271_vm1, %v2270_v6 }
 0x560   :  { %2091 = vmatmul.mubr.msk.f32.vlgmr.msra.gmra.mxu1 %vm157_vm2, %v908_v30 }
 0x561   :  { %2100 = vmatprep.mubr.msk.f32.mxu1 %vm2271_vm1, %v2270_v6 }
 0x618   :  { %v2469_v31 = vpop.f32.mrf.mxu0 }
 0x61a   :  { %v2077_v32 = vpop.f32.mrf.mxu0 }
 0x61c   :  { %v2471_v33 = vpop.f32.mrf.mxu1  ;;  %v903_v34 = vpop.f32.mrf.mxu0 }
 0x61d   :  { %v985_v35 = vmul.f32 0.35355338, %v903_v34 }
 0x61e   :  { %v2082_v36 = vpop.f32.mrf.mxu1  ;;  %v2087_v37 = vpop.f32.mrf.mxu0 }
 0x61f   :  { %v987_v38 = vsel %vm157_vm2, %v985_v35, -inf }
 0x620   :  { %v981_v39 = vpop.f32.mrf.mxu1  ;;  %988 = vmax.xlane.f32.xlu0 %v987_v38 }
 0x621   :  { %v986_v40 = vmul.f32 0.35355338, %v981_v39 }
 0x622   :  { %v2092_v41 = vpop.f32.mrf.mxu1 }
 0x623   :  { %v990_v42 = vsel %vm157_vm2, %v986_v40, -inf }
 0x624   :  { %991 = vmax.xlane.f32.xlu1 %v990_v42 }
 0x635   :  { %1015 = vrot.lane.b32.xlu1 %v2391_v10, %s2279_s14 }
 0x639   :  { %1169 = vrot.lane.b32.xlu1 %v2391_v10, %s2280_s15 }
 0x63d   :  { %1247 = vrot.lane.b32.xlu1 %v2394_v11, %s2280_s15 }
 0x641   :  { %1245 = vrot.lane.b32.xlu1 %v2394_v11, %s2281_s16 }
 0x6a9   :  { %v989_v43 = vpop.xlane.xlu0 %988 }
 0x6aa   :  { %v993_v44 = vsub.f32 %v985_v35, %v989_v43 }
 0x6ac   :  { %v995_v45 = vmul.f32 1.442695, %v993_v44 }
 0x6ad   :  { %v992_v46 = vpop.xlane.xlu1 %991 }
 0x6ae   :  { %2199 = vpow2.f32 %v995_v45  ;;  %v994_v47 = vsub.f32 %v986_v40, %v992_v46 }
 0x6b0   :  { %v997_v48 = vmul.f32 1.442695, %v994_v47 }
 0x6b1   :  { %v1016_v49 = vpop.permute.xlu1 %1015 }
 0x6b2   :  { %2201 = vpow2.f32 %v997_v48  ;;  %2094 = vmatpush3.msra.mxu0 %v1016_v49  ;;  %v1539_v48 = vld [vmem:[%s2619_s3 + $0x10] sm:$0xff]  ;;  %v1538_v49 = vld [vmem:[%s2619_s3 + $0x8] sm:$0xff] }
 0x6b3   :  { %2103 = vmatprep.subr.mxu0 %v2270_v6 }
 0x6b5   :  { %v1170_v63 = vpop.permute.xlu1 %1169 }
 0x6b9   :  { %v1248_v8 = vpop.permute.xlu1 %1247 }
 0x6bb   :  { %v2200_v51 = vpop.eup %2199 }
 0x6bc   :  { %v999_v53 = vsel %vm157_vm2, %v2200_v51, 0.0 }
 0x6bd   :  { %1000 = vadd.xlane.f32.xlu0 %v999_v53  ;;  %v1246_v13 = vpop.permute.xlu1 %1245 }
 0x6bf   :  { %v2202_v54 = vpop.eup %2201 }
 0x6c0   :  { %v1002_v55 = vsel %vm157_vm2, %v2202_v54, 0.0 }
 0x6c1   :  { %1003 = vadd.xlane.f32.xlu0 %v1002_v55 }
 0x6d7   :  { %1091 = vrot.lane.b32.xlu0 %v2394_v11, %s2279_s14 }
 0x6db   :  { %1167 = vrot.lane.b32.xlu0 %v2391_v10, %s2281_s16 }
 0x746   :  { %v1001_v56 = vpop.xlane.xlu0 %1000 }
 0x747   :  { %2203 = vrcp.f32 %v1001_v56 }
 0x74a   :  { %v1004_v57 = vpop.xlane.xlu0 %1003 }
 0x74b   :  { %2205 = vrcp.f32 %v1004_v57 }
 0x74e   :  { %v1092_v58 = vpop.permute.xlu0 %1091 }
 0x74f   :  { %2099 = vmatpush3.msra.mxu1 %v1092_v58 }
 0x750   :  { %2108 = vmatprep.subr.mxu1 %v2270_v6 }
 0x752   :  { %v1168_v12 = vpop.permute.xlu0 %1167 }
 0x754   :  { %v2204_v59 = vpop.eup %2203 }
 0x755   :  { %v1007_v60 = vmul.f32 %v2204_v59, %v1001_v56 }
 0x757   :  { %v1009_v61 = vsub.f32 2.0, %v1007_v60 }
 0x758   :  { %v2206_v62 = vpop.eup %2205 }
 0x759   :  { %v1011_v0 = vmul.f32 %v2204_v59, %v1009_v61  ;;  %v1008_v1 = vmul.f32 %v2206_v62, %v1004_v57 }
 0x75b   :  { %v1013_v3 = vmul.f32 %v2200_v51, %v1011_v0  ;;  %v1010_v4 = vsub.f32 2.0, %v1008_v1  ;;  %v1537_v51 = vld [vmem:[%s2619_s3] sm:$0xff] }
 0x75d   :  { %v1012_v7 = vmul.f32 %v2206_v62, %v1010_v4  ;;  %2096 = vmatmul.mubr.msk.f32.vlgmr.msra.gmra.mxu0 %vm157_vm2, %v1013_v3 }
 0x75e   :  { %2104 = vmatpush3.xpose.msk.msra.mxu0 %vm157_vm2, %v1170_v63  ;;  %2105 = vmatprep.mubr.msk.f32.mxu0 %vm2271_vm1, %v2270_v6 }
 0x75f   :  { %v1014_v9 = vmul.f32 %v2202_v54, %v1012_v7  ;;  %2113 = vmatprep.subr.mxu0 %v2270_v6 }
 0x761   :  { %2101 = vmatmul.mubr.msk.f32.vlgmr.msra.gmra.mxu1 %vm157_vm2, %v1014_v9  ;;  %2106 = vmatmul.mubr.msk.f32.vlgmr.msra.gmra.mxu0 %vm157_vm2, %v1168_v12 }
 0x762   :  { %2109 = vmatpush3.xpose.msk.msra.mxu1 %vm157_vm2, %v1248_v8  ;;  %2110 = vmatprep.mubr.msk.f32.mxu1 %vm2271_vm1, %v2270_v6  ;;  %v1959_v8 = vld [vmem:[%s2620_s4] ss:$0 sm:$0xff] }
 0x763   :  { %2118 = vmatprep.subr.mxu1 %v2270_v6  ;;  %2115 = vmatprep.mubr.msk.f32.mxu0 %vm2271_vm1, %v2270_v6 }
 0x765   :  { %2111 = vmatmul.mubr.msk.f32.vlgmr.msra.gmra.mxu1 %vm157_vm2, %v1246_v13 }
 0x766   :  { %2120 = vmatprep.mubr.msk.f32.mxu1 %vm2271_vm1, %v2270_v6 }
 0x81d   :  { %v1087_v14 = vpop.f32.mrf.mxu0 }
 0x81f   :  { %v2097_v15 = vpop.f32.mrf.mxu0 }
 0x821   :  { %v1163_v16 = vpop.f32.mrf.mxu1  ;;  %v1241_v17 = vpop.f32.mrf.mxu0 }
 0x822   :  { %v1323_v18 = vmul.f32 0.35355338, %v1241_v17 }
 0x823   :  { %v2102_v19 = vpop.f32.mrf.mxu1  ;;  %v2107_v20 = vpop.f32.mrf.mxu0 }
 0x824   :  { %v1325_v21 = vsel %vm157_vm2, %v1323_v18, -inf }
 0x825   :  { %v1319_v22 = vpop.f32.mrf.mxu1  ;;  %1326 = vmax.xlane.f32.xlu0 %v1325_v21 }
 0x826   :  { %v1324_v23 = vmul.f32 0.35355338, %v1319_v22 }
 0x827   :  { %v2112_v24 = vpop.f32.mrf.mxu1 }
 0x828   :  { %v1328_v25 = vsel %vm157_vm2, %v1324_v23, -inf }
 0x829   :  { %1329 = vmax.xlane.f32.xlu1 %v1328_v25  ;;  %v1679_v25 = vld [vmem:[%s2623_s7 + $0x18] sm:$0xff] }
 0x83a   :  { %1353 = vrot.lane.b32.xlu1 %v2391_v10, %s2282_s17 }
 0x83e   :  { %1507 = vrot.lane.b32.xlu1 %v2469_v31, %s2269_s29 }
 0x842   :  { %1509 = vrot.lane.b32.xlu1 %v2471_v33, %s2269_s29 }
 0x846   :  { %1517 = vrot.lane.b32.xlu1 %v1163_v16, %s2283_s18 }
 0x8ae   :  { %v1327_v6 = vpop.xlane.xlu0 %1326 }
 0x8af   :  { %v1331_v26 = vsub.f32 %v1323_v18, %v1327_v6  ;;  %v1678_v6 = vld [vmem:[%s2623_s7 + $0x10] sm:$0xff] }
 0x8b1   :  { %v1333_v27 = vmul.f32 1.442695, %v1331_v26  ;;  %v1677_v26 = vld [vmem:[%s2623_s7 + $0x8] sm:$0xff] }
 0x8b2   :  { %v1330_v28 = vpop.xlane.xlu1 %1329 }
 0x8b3   :  { %2207 = vpow2.f32 %v1333_v27  ;;  %v1332_v29 = vsub.f32 %v1324_v23, %v1330_v28  ;;  %v1676_v27 = vld [vmem:[%s2623_s7] sm:$0xff]  ;;  %v1777_v28 = vld [vmem:[%s2625_s9 + $0x38] sm:$0xff] }
 0x8b5   :  { %v1335_v30 = vmul.f32 1.442695, %v1332_v29  ;;  %v1776_v29 = vld [vmem:[%s2625_s9 + $0x30] sm:$0xff] }
 0x8b6   :  { %v1354_v32 = vpop.permute.xlu1 %1353 }
 0x8b7   :  { %2209 = vpow2.f32 %v1335_v30  ;;  %2114 = vmatpush3.msra.mxu0 %v1354_v32  ;;  %v1775_v30 = vld [vmem:[%s2625_s9 + $0x28] sm:$0xff]  ;;  %v1774_v32 = vld [vmem:[%s2625_s9 + $0x20] sm:$0xff] }
 0x8ba   :  { %v1508_v57 = vpop.permute.xlu1 %1507 }
 0x8bb   :  { %v1529_v60 = vsel %vm157_vm2, %v2437_v50, %v1508_v57 }
 0x8be   :  { %v1510_v58 = vpop.permute.xlu1 %1509 }
 0x8bf   :  { %v1530_v1 = vsel %vm157_vm2, %v2439_v52, %v1510_v58 }
 0x8c0   :  { %v2208_v34 = vpop.eup %2207 }
 0x8c1   :  { %v1337_v10 = vsel %vm157_vm2, %v2208_v34, 0.0 }
 0x8c2   :  { %1338 = vadd.xlane.f32.xlu0 %v1337_v10  ;;  %v1518_v61 = vpop.permute.xlu1 %1517 }
 0x8c3   :  { %v1533_v3 = vsel %vm1531_vm4, %v1530_v1, %v1518_v61 }
 0x8c4   :  { %v2210_v31 = vpop.eup %2209 }
 0x8c5   :  { %v1340_v35 = vsel %vm157_vm2, %v2210_v31, 0.0 }
 0x8c6   :  { %1341 = vadd.xlane.f32.xlu0 %v1340_v35 }
 0x8dc   :  { %1429 = vrot.lane.b32.xlu0 %v2394_v11, %s2282_s17  ;;  %v1540_v11 = vld [vmem:[%s2619_s3 + $0x18] sm:$0xff] }
 0x8dd   :  { %2123 = vmatprep.subr.mxu0 %v1540_v11 }
 0x8e0   :  { %1515 = vrot.lane.b32.xlu0 %v1087_v14, %s2283_s18 }
 0x94b   :  { %v1339_v33 = vpop.xlane.xlu0 %1338 }
 0x94c   :  { %2211 = vrcp.f32 %v1339_v33 }
 0x94f   :  { %v1342_v36 = vpop.xlane.xlu0 %1341 }
 0x950   :  { %2213 = vrcp.f32 %v1342_v36 }
 0x953   :  { %v1430_v37 = vpop.permute.xlu0 %1429 }
 0x954   :  { %2119 = vmatpush3.msra.mxu1 %v1430_v37 }
 0x955   :  { %2134 = vmatprep.subr.mxu1 %v1679_v25 }
 0x957   :  { %v1516_v59 = vpop.permute.xlu0 %1515 }
 0x958   :  { %v1532_v62 = vsel %vm1531_vm4, %v1529_v60, %v1516_v59  ;;  %v1967_v59 = vld [vmem:[%s2626_s10] ss:$0 sm:$0xff] }
 0x959   :  { %v2212_v38 = vpop.eup %2211 }
 0x95a   :  { %v1345_v39 = vmul.f32 %v2212_v38, %v1339_v33 }
 0x95c   :  { %v1347_v40 = vsub.f32 2.0, %v1345_v39 }
 0x95d   :  { %v2214_v41 = vpop.eup %2213 }
 0x95e   :  { %v1349_v42 = vmul.f32 %v2212_v38, %v1347_v40  ;;  %v1346_v43 = vmul.f32 %v2214_v41, %v1342_v36  ;;  %v1962_v38 = vld [vmem:[%s2621_s5] ss:$0 sm:$0xff] }
 0x95f   :  { %v1963_v40 = vld [vmem:[%s2622_s6] ss:$0 sm:$0xff] }
 0x960   :  { %v1351_v44 = vmul.f32 %v2208_v34, %v1349_v42  ;;  %v1348_v45 = vsub.f32 2.0, %v1346_v43 }
 0x962   :  { %v1350_v46 = vmul.f32 %v2214_v41, %v1348_v45  ;;  %2116 = vmatmul.mubr.msk.f32.vlgmr.msra.gmra.mxu0 %vm157_vm2, %v1351_v44 }
 0x963   :  { %2124 = vmatpush3.msra.mxu0 %v1540_v11 }
 0x964   :  { %v1352_v47 = vmul.f32 %v2210_v31, %v1350_v46  ;;  %2125 = vmatprep.subr.mxu0 %v1539_v48 }
 0x965   :  { %2126 = vmatpush3.msra.mxu0 %v1539_v48  ;;  %v1773_v48 = vld [vmem:[%s2625_s9 + $0x18] sm:$0xff] }
 0x966   :  { %2121 = vmatmul.mubr.msk.f32.vlgmr.msra.gmra.mxu1 %vm157_vm2, %v1352_v47  ;;  %2127 = vmatprep.subr.mxu0 %v1538_v49 }
 0x967   :  { %2128 = vmatpush3.msra.mxu0 %v1538_v49  ;;  %2135 = vmatpush3.msra.mxu1 %v1679_v25  ;;  %v1770_v49 = vld [vmem:[%s2625_s9] sm:$0xff] }
 0x968   :  { %2129 = vmatprep.subr.mxu0 %v1537_v51  ;;  %2136 = vmatprep.subr.mxu1 %v1678_v6  ;;  %v1971_v25 = vld [vmem:[%s2628_s12] ss:$0 sm:$0xff] }
 0x969   :  { %2130 = vmatpush3.msra.mxu0 %v1537_v51  ;;  %2137 = vmatpush3.msra.mxu1 %v1678_v6  ;;  %v1964_v51 = vld [vmem:[%s2624_s8] ss:$0 sm:$0xff] }
 0x96a   :  { %2138 = vmatprep.subr.mxu1 %v1677_v26  ;;  %2145 = vmatprep.subr.mxu0 %v1777_v28 }
 0x96b   :  { %2139 = vmatpush3.msra.mxu1 %v1677_v26 }
 0x96c   :  { %2140 = vmatprep.subr.mxu1 %v1676_v27 }
 0x96d   :  { %2141 = vmatpush3.msra.mxu1 %v1676_v27 }
 0xa22   :  { %v1425_v53 = vpop.f32.mrf.mxu0 }
 0xa23   :  { %1523 = vrot.lane.b32.xlu0 %v1425_v53, %s2284_s24 }
 0xa24   :  { %v2117_v54 = vpop.f32.mrf.mxu0 }
 0xa26   :  { %v1501_v55 = vpop.f32.mrf.mxu1 }
 0xa27   :  { %1525 = vrot.lane.b32.xlu1 %v1501_v55, %s2284_s24 }
 0xa28   :  { %v2122_v56 = vpop.f32.mrf.mxu1 }
 0xa95   :  { %v1524_v63 = vpop.permute.xlu0 %1523 }
 0xa96   :  { %v1535_v0 = vsel %vm1534_vm3, %v1532_v62, %v1524_v63 }
 0xa97   :  { %2131 = vmatprep.mubr.msk.f32.mxu0 %vm72_vm0, %v1535_v0 }
 0xa99   :  { %v1526_v4 = vpop.permute.xlu1 %1525 }
 0xa9a   :  { %v1536_v7 = vsel %vm1534_vm3, %v1533_v3, %v1526_v4 }
 0xa9b   :  { %2132 = vmatmul.mubr.msk.f32.vlgmr.msra.gmra.mxu0 %vm72_vm0, %v1536_v7 }
 0xa9c   :  { %2146 = vmatpush3.msra.mxu0 %v1777_v28 }
 0xa9d   :  { %2147 = vmatprep.subr.mxu0 %v1776_v29 }
 0xa9e   :  { %2148 = vmatpush3.msra.mxu0 %v1776_v29 }
 0xa9f   :  { %2149 = vmatprep.subr.mxu0 %v1775_v30 }
 0xaa0   :  { %2150 = vmatpush3.msra.mxu0 %v1775_v30 }
 0xaa1   :  { %2151 = vmatprep.subr.mxu0 %v1774_v32 }
 0xaa2   :  { %2152 = vmatpush3.msra.mxu0 %v1774_v32 }
 0xaa3   :  { %2153 = vmatprep.subr.mxu0 %v1773_v48 }
 0xaa4   :  { %2154 = vmatpush3.msra.mxu0 %v1773_v48 }
 0xb5b   :  { %v2133_v50 = vpop.f32.mrf.mxu0 }
 0xb5c   :  { %v1626_v9 = vadd.f32 %v2133_v50, %v1959_v8 }
 0xb5d   :  { %v1620_v12 = vpop.f32.mrf.mxu0 }
 0xb5e   :  { %v1621_v13 = vadd.f32 %v1959_v8, %v1620_v12  ;;  %v1634_v14 = vsel %vm72_vm0, %v1626_v9, 0.0 }
 0xb5f   :  { %1635 = vadd.xlane.f32.xlu1 %v1634_v14 }
 0xb60   :  { %v1631_v15 = vsel %vm72_vm0, %v1621_v13, 0.0 }
 0xb61   :  { %1632 = vadd.xlane.f32.xlu0 %v1631_v15 }
 0xbe8   :  { %v1636_v52 = vpop.xlane.xlu1 %1635 }
 0xbe9   :  { %v1639_v16 = vmul.f32 0.03125, %v1636_v52 }
 0xbea   :  { %v1633_v17 = vpop.xlane.xlu0 %1632 }
 0xbeb   :  { %v1638_v18 = vmul.f32 0.03125, %v1633_v17  ;;  %v1641_v19 = vsub.f32 %v1626_v9, %v1639_v16 }
 0xbed   :  { %v1640_v20 = vsub.f32 %v1621_v13, %v1638_v18  ;;  %v1643_v23 = vmul.f32 %v1641_v19, %v1641_v19 }
 0xbef   :  { %v1642_v21 = vmul.f32 %v1640_v20, %v1640_v20  ;;  %v1647_v24 = vsel %vm72_vm0, %v1643_v23, 0.0 }
 0xbf1   :  { %v1644_v22 = vsel %vm72_vm0, %v1642_v21, 0.0 }
 0xbf2   :  { %1645 = vadd.xlane.f32.xlu0 %v1644_v22  ;;  %v1970_v22 = vld [vmem:[%s2627_s11] ss:$0 sm:$0xff]  ;;  %s2243_s11 = scalar_lea.vmem %s1921_s0, 256 }
 0xbf3   :  { %p2244_p5 = scmp.ne.s32.totalorder %s1921_s0, %s2243_s11  ;;  %p2249_p7 = scmp.lt.s32.totalorder %s2243_s11, %s2243_s11 }
 0xbf5   :  { %p2250_p8 = por %p2249_p7, %p2248_p6 }
 0xbf6   :  { %1648 = vadd.xlane.f32.xlu0 %v1647_v24 }
 0xbf7   :  { %p2251_p9 = pnand %p2250_p8, %p2244_p5 }
 0xc7b   :  { %v1646_v34 = vpop.xlane.xlu0 %1645 }
 0xc7c   :  { %v1650_v10 = vmul.f32 0.03125, %v1646_v34 }
 0xc7e   :  { %v1652_v31 = vadd.f32 1e-05, %v1650_v10 }
 0xc7f   :  { %v1649_v35 = vpop.xlane.xlu0 %1648 }
 0xc80   :  { %2215 = vrsqrt.f32 %v1652_v31  ;;  %v1651_v33 = vmul.f32 0.03125, %v1649_v35 }
 0xc82   :  { %v1653_v36 = vadd.f32 1e-05, %v1651_v33 }
 0xc84   :  { %2217 = vrsqrt.f32 %v1653_v36 }
 0xc8d   :  { %v2216_v37 = vpop.eup %2215 }
 0xc8e   :  { %v1656_v39 = vmul.f32 %v2216_v37, %v1640_v20 }
 0xc90   :  { %v1664_v41 = vmul.f32 %v1962_v38, %v1656_v39 }
 0xc91   :  { %v2218_v42 = vpop.eup %2217 }
 0xc92   :  { %v1657_v43 = vmul.f32 %v2218_v42, %v1641_v19  ;;  %v1672_v44 = vadd.f32 %v1963_v40, %v1664_v41 }
 0xc94   :  { %v1665_v45 = vmul.f32 %v1962_v38, %v1657_v43  ;;  %v2569_v46 = vadd.f32 %v1672_v44, %v2368_v2  ;;  %v1772_v2 = vld [vmem:[%s2625_s9 + $0x10] sm:$0xff] }
 0xc95   :  { %2155 = vmatprep.subr.mxu0 %v1772_v2 }
 0xc96   :  { %v1673_v47 = vadd.f32 %v1963_v40, %v1665_v45  ;;  %2142 = vmatprep.mubr.msk.f32.mxu1 %vm72_vm0, %v2569_v46  ;;  %2156 = vmatpush3.msra.mxu0 %v1772_v2 }
 0xc98   :  { %v2574_v11 = vadd.f32 %v1673_v47, %v2378_v5  ;;  %v1771_v5 = vld [vmem:[%s2625_s9 + $0x8] sm:$0xff] }
 0xc99   :  { %2157 = vmatprep.subr.mxu0 %v1771_v5 }
 0xc9a   :  { %2143 = vmatmul.mubr.msk.f32.vlgmr.msra.gmra.mxu1 %vm72_vm0, %v2574_v11  ;;  %2158 = vmatpush3.msra.mxu0 %v1771_v5 }
 0xc9b   :  { %2159 = vmatprep.subr.mxu0 %v1770_v49 }
 0xc9c   :  { %2160 = vmatpush3.msra.mxu0 %v1770_v49 }
 0xd5a   :  { %v2144_v53 = vpop.f32.mrf.mxu1 }
 0xd5b   :  { %v1765_v54 = vadd.f32 %v2144_v53, %v1964_v51 }
 0xd5c   :  { %v1759_v55 = vpop.f32.mrf.mxu1 }
 0xd5d   :  { %v1760_v56 = vadd.f32 %v1964_v51, %v1759_v55  ;;  %v1769_v58 = vmax.f32 %v1765_v54, 0.0 }
 0xd5f   :  { %v1768_v57 = vmax.f32 %v1760_v56, 0.0 }
 0xd61   :  { %2161 = vmatprep.mubr.msk.f32.mxu0 %vm1785_vm5, %v1768_v57 }
 0xd62   :  { %2162 = vmatmul.mubr.msk.f32.vlgmr.msra.gmra.mxu0 %vm1785_vm5, %v1769_v58 }
 0xe22   :  { %v2163_v60 = vpop.f32.mrf.mxu0 }
 0xe23   :  { %v1864_v61 = vadd.f32 %v2163_v60, %v1967_v59 }
 0xe24   :  { %v1858_v62 = vpop.f32.mrf.mxu0 }
 0xe25   :  { %v1859_v63 = vadd.f32 %v1967_v59, %v1858_v62  ;;  %v1872_v0 = vsel %vm72_vm0, %v1864_v61, 0.0 }
 0xe26   :  { %1873 = vadd.xlane.f32.xlu0 %v1872_v0 }
 0xe27   :  { %v1869_v1 = vsel %vm72_vm0, %v1859_v63, 0.0 }
 0xe28   :  { %1870 = vadd.xlane.f32.xlu1 %v1869_v1 }
 0xeaf   :  { %v1874_v3 = vpop.xlane.xlu0 %1873 }
 0xeb0   :  { %v1876_v4 = vmul.f32 0.03125, %v1874_v3 }
 0xeb1   :  { %v1871_v7 = vpop.xlane.xlu1 %1870 }
 0xeb2   :  { %v1878_v8 = vsub.f32 %v1864_v61, %v1876_v4  ;;  %v1875_v50 = vmul.f32 0.03125, %v1871_v7 }
 0xeb4   :  { %v1877_v9 = vsub.f32 %v1859_v63, %v1875_v50  ;;  %v1880_v12 = vmul.f32 %v1878_v8, %v1878_v8 }
 0xeb6   :  { %v1884_v13 = vsel %vm72_vm0, %v1880_v12, 0.0  ;;  %v1879_v14 = vmul.f32 %v1877_v9, %v1877_v9 }
 0xeb7   :  { %1885 = vadd.xlane.f32.xlu0 %v1884_v13 }
 0xeb8   :  { %v1881_v15 = vsel %vm72_vm0, %v1879_v14, 0.0 }
 0xeb9   :  { %1882 = vadd.xlane.f32.xlu1 %v1881_v15 }
 0xf40   :  { %v1886_v52 = vpop.xlane.xlu0 %1885 }
 0xf41   :  { %v1888_v16 = vmul.f32 0.03125, %v1886_v52 }
 0xf42   :  { %v1883_v17 = vpop.xlane.xlu1 %1882 }
 0xf43   :  { %v1890_v18 = vadd.f32 1e-05, %v1888_v16  ;;  %v1887_v19 = vmul.f32 0.03125, %v1883_v17 }
 0xf45   :  { %2219 = vrsqrt.f32 %v1890_v18  ;;  %v1889_v20 = vadd.f32 1e-05, %v1887_v19 }
 0xf47   :  { %2221 = vrsqrt.f32 %v1889_v20 }
 0xf52   :  { %v2220_v21 = vpop.eup %2219 }
 0xf53   :  { %v1894_v23 = vmul.f32 %v2220_v21, %v1878_v8 }
 0xf54   :  { %v2222_v24 = vpop.eup %2221 }
 0xf55   :  { %v1893_v6 = vmul.f32 %v2222_v24, %v1877_v9  ;;  %v1902_v26 = vmul.f32 %v1970_v22, %v1894_v23 }
 0xf57   :  { %v1901_v27 = vmul.f32 %v1970_v22, %v1893_v6  ;;  %v1910_v28 = vadd.f32 %v1971_v25, %v1902_v26 }
 0xf59   :  { %v1909_v29 = vadd.f32 %v1971_v25, %v1901_v27  ;;  %v1912_v30 = vadd.f32 %v1910_v28, %v2574_v11 }
 0xf5b   :  { %v1911_v32 = vadd.f32 %v1909_v29, %v2569_v46  ;;  %1914 = vst.msk [vmem:[#allocation5 + $0x8] sm:$0xff] %vm72_vm0, %v1912_v30 }
 0xf5d   :  { %1913 = vst.msk [vmem:[#allocation5] sm:$0xff] %vm72_vm0, %v1911_v32 }
 0xf5e   :  { %2254 = shalt.err (!%p2251_p9)
}
 0xf5f   :  { %1926 = dma.vmem_to_hbm [thread:$0]  %s1921_s0, 256, %s2629_s13, [#allocation4], %s2268_s28, %s2268_s28, %s2269_s29  }
 0xf60   :  { %2265 = dma.done.wait [#allocation4], 256  }
 0xf61   :  { %2266 = vsyncadd [#allocation4], 4294967040 }
 0xf62   :  { %1930 = vsyncpa [#allocation3], 1 }
 0xf63   :  { %1931 = vsyncpa [#allocation4], 1 }

</bundles_post_ra>
